<compile_context>
chip_gen: v7x
topology: tpu7x:2x2x1
jax: 0.10.0
libtpu: 0.0.40
codegen_flags: <defaults>
</compile_context>

<pallas_src>
import functools

import jax
import jax.numpy as jnp
from jax.experimental import pallas as pl
from jax.experimental.pallas import tpu as pltpu

_MIB = 1024 * 1024


def _round_up(v, m):
    return ((v + m - 1) // m) * m


def _tpu_hw():
    """(vmem_capacity_bytes, multi_tensorcore?) with conservative fallbacks."""
    vmem_cap = None
    try:
        vmem_cap = int(pltpu.get_tpu_info().vmem_capacity_bytes)
    except Exception:
        pass
    kind = ""
    try:
        kind = (jax.devices()[0].device_kind or "").lower()
    except Exception:
        pass
    if vmem_cap is None:
        if "v7" in kind:
            vmem_cap = 64 * _MIB
        elif "v2" in kind or "v3" in kind:
            vmem_cap = 16 * _MIB
        elif kind:
            vmem_cap = 128 * _MIB
        else:
            vmem_cap = 64 * _MIB  # unknown: be conservative
    multi_tc = any(t in kind for t in ("v7", "v4", "v5p"))
    return vmem_cap, multi_tc


def _largest_div_mult128(d, cap):
    """Largest multiple of 128 that divides d and is <= cap (>= 128)."""
    best = 128
    for t in range(128, min(d, cap) + 1, 128):
        if d % t == 0:
            best = t
    return best


# ----------------------------------------------------------------------------
# Kernels
# ----------------------------------------------------------------------------
def _resblock_full_k_kernel(x_ref, w_ref, b_ref, o_ref, *, tn, single_col):
    # x_ref: (br, D) full-K LHS tile, native dtype -> MXU directly.
    # w_ref: (D, tn) W^T column tile; b_ref: (1, tn); o_ref: (br, tn).
    acc = jnp.dot(x_ref[...], w_ref[...], preferred_element_type=jnp.float32)
    if single_col:
        xres = x_ref[...]                       # tn == D: whole resident tile
    else:
        # Residual columns sliced out of the resident LHS tile (no extra DMA).
        start = pl.multiple_of(pl.program_id(1) * tn, 128)
        xres = x_ref[:, pl.ds(start, tn)]
    acc = acc + b_ref[...].astype(jnp.float32) + xres.astype(jnp.float32)
    o_ref[...] = jnp.maximum(acc, 0.0).astype(o_ref.dtype)


def _resblock_ktiled_kernel(x_ref, w_ref, b_ref, xres_ref, o_ref, acc_ref):
    # K-tiled fallback for very large D: x_ref (br, tk), w_ref (tk, tn),
    # residual streamed separately, f32 accumulator scratch across K.
    k = pl.program_id(2)

    @pl.when(k == 0)
    def _():
        acc_ref[...] = jnp.zeros_like(acc_ref)

    acc_ref[...] += jnp.dot(x_ref[...], w_ref[...],
                            preferred_element_type=jnp.float32)

    @pl.when(k == pl.num_programs(2) - 1)
    def _():
        acc = (acc_ref[...] + b_ref[...].astype(jnp.float32)
               + xres_ref[...].astype(jnp.float32))
        o_ref[...] = jnp.maximum(acc, 0.0).astype(o_ref.dtype)


# ----------------------------------------------------------------------------
# Wrapper
# ----------------------------------------------------------------------------
@functools.partial(jax.jit,
                   static_argnames=("block_rows", "block_cols", "force_k_tiling"))
def resblock_forward(x, w_t, b, block_rows=None, block_cols=None,
                     force_k_tiling=False):
    """relu(x @ w_t + b + x).

    x:   (B, D)
    w_t: (D, D)  -- PyTorch weight pre-transposed to (in_features, out_features)
    b:   (D,)
    """
    B, D = x.shape
    assert w_t.shape == (D, D)
    assert b.shape == (D,)
    b2 = b.reshape(1, D)

    isz = x.dtype.itemsize
    wsz = w_t.dtype.itemsize
    bsz = b.dtype.itemsize
    osz = isz  # output dtype == x.dtype

    vmem_cap, multi_tc = _tpu_hw()
    # Generation-aware resident-footprint budget (footprint already counts the
    # double-buffering, so no extra 2x).
    if vmem_cap >= 96 * _MIB:
        budget = min(100 * _MIB, int(vmem_cap * 0.78))   # v5e / v6e
    else:
        budget = int(vmem_cap * 0.68)                    # v7x: ~44 MiB of 64
    headroom = min(12 * _MIB, max(2 * _MIB, vmem_cap // 8))

    # ---- row tile -----------------------------------------------------------
    br_cap = block_rows if block_rows is not None else (
        1024 if vmem_cap >= 96 * _MIB else 512)
    br = min(_round_up(br_cap, 8), _round_up(B, 8))
    # Only force >=2 row blocks on multi-TensorCore chips (megacore sharding).
    if multi_tc and B > 8 and pl.cdiv(B, br) < 2:
        br = _round_up(pl.cdiv(B, 2), 8)

    # ---- column-tile candidates (divisors of D, lane-dense) -----------------
    if D % 128 == 0:
        col_cands = [t for t in range(D, 127, -128) if D % t == 0]
    else:
        col_cands = [D]  # small / unaligned D: single full-width block
    if block_cols is not None:
        filt = [t for t in col_cands if t <= block_cols]
        col_cands = filt or [col_cands[-1]]

    def full_k_footprint(br_, tn_):
        return (2 * br_ * D * isz        # x tile (full K), double-buffered
                + 2 * D * tn_ * wsz      # W^T column tile
                + 2 * tn_ * bsz          # bias tile
                + 2 * br_ * tn_ * osz)   # output tile

    tn = col_cands[0]
    # Shrink rows first (down to 256), then columns (down to 512).
    while full_k_footprint(br, tn) > budget and br > 256:
        br = max(256, _round_up(br // 2, 8))
    ci = 0
    while (full_k_footprint(br, tn) > budget and tn > 512
           and ci + 1 < len(col_cands)):
        ci += 1
        tn = col_cands[ci]

    use_k_tiling = force_k_tiling or (
        D % 128 == 0 and full_k_footprint(br, tn) > budget)
    if use_k_tiling and D % 128 != 0:
        use_k_tiling = False  # K-tiling needs lane-aligned K blocks

    # =========================================================================
    # Path A: full-K LHS tile, residual sliced from the resident x tile.
    # =========================================================================
    if not use_k_tiling:
        grid = (pl.cdiv(B, br), pl.cdiv(D, tn))
        fp = full_k_footprint(br, tn)
        vmem_limit = int(min(max(fp + headroom, 16 * _MIB),
                             vmem_cap - max(2 * _MIB, vmem_cap // 16)))
        # Pin the megacore split to the row axis; flip only when B << D.
        sem = (("arbitrary", "parallel") if (grid[0] == 1 and grid[1] > 1)
               else ("parallel", "arbitrary"))
        w_bytes = D * D * wsz * (grid[0] if tn < D else 1)
        cost = pl.CostEstimate(
            flops=2 * B * D * D + 3 * B * D,
            transcendentals=0,
            bytes_accessed=B * D * isz + B * D * osz + w_bytes + D * bsz,
        )
        kernel = functools.partial(_resblock_full_k_kernel, tn=tn,
                                   single_col=(grid[1] == 1))
        return pl.pallas_call(
            kernel,
            out_shape=jax.ShapeDtypeStruct((B, D), x.dtype),
            grid_spec=pltpu.PrefetchScalarGridSpec(
                num_scalar_prefetch=0,
                grid=grid,
                in_specs=[
                    pl.BlockSpec((br, D), lambda i, j: (i, 0)),   # x (full K)
                    pl.BlockSpec((D, tn), lambda i, j: (0, j)),   # W^T cols
                    pl.BlockSpec((1, tn), lambda i, j: (0, j)),   # bias
                ],
                out_specs=pl.BlockSpec((br, tn), lambda i, j: (i, j)),
            ),
            compiler_params=pltpu.CompilerParams(
                dimension_semantics=sem,
                vmem_limit_bytes=vmem_limit,
            ),
            cost_estimate=cost,
        )(x, w_t, b2)

    # =========================================================================
    # Path B: K-tiled fallback (very large D) — f32 accumulator scratch,
    # K last in the grid and marked "arbitrary".
    # =========================================================================
    br_b = min(512, _round_up(B, 8))
    if multi_tc and B > 8 and pl.cdiv(B, br_b) < 2:
        br_b = _round_up(pl.cdiv(B, 2), 8)
    tn_b = _largest_div_mult128(D, 512)
    tk = _largest_div_mult128(D, 128 if force_k_tiling else 1024)

    def ktiled_footprint(br_, tn_, tk_):
        return (2 * br_ * tk_ * isz      # x K-tile
                + 2 * tk_ * tn_ * wsz    # W tile
                + 2 * tn_ * bsz          # bias tile
                + 2 * br_ * tn_ * isz    # residual tile
                + 2 * br_ * tn_ * osz    # output tile
                + br_ * tn_ * 4)         # f32 accumulator scratch

    while ktiled_footprint(br_b, tn_b, tk) > budget and tk > 128:
        tk = _largest_div_mult128(D, tk - 128)

    grid = (pl.cdiv(B, br_b), D // tn_b, D // tk)
    fp = ktiled_footprint(br_b, tn_b, tk)
    vmem_limit = int(min(max(fp + headroom, 16 * _MIB),
                         vmem_cap - max(2 * _MIB, vmem_cap // 16)))
    sem = (("arbitrary", "parallel", "arbitrary")
           if (grid[0] == 1 and grid[1] > 1)
           else ("parallel", "arbitrary", "arbitrary"))
    cost = pl.CostEstimate(
        flops=2 * B * D * D + 3 * B * D,
        transcendentals=0,
        bytes_accessed=(B * D * isz * grid[1]      # x re-streamed per col block
                        + D * D * wsz * grid[0]    # W re-streamed per row block
                        + B * D * isz              # residual
                        + B * D * osz + D * bsz),
    )
    return pl.pallas_call(
        _resblock_ktiled_kernel,
        out_shape=jax.ShapeDtypeStruct((B, D), x.dtype),
        grid_spec=pltpu.PrefetchScalarGridSpec(
            num_scalar_prefetch=0,
            grid=grid,
            in_specs=[
                pl.BlockSpec((br_b, tk), lambda i, j, k: (i, k)),   # x K-tile
                pl.BlockSpec((tk, tn_b), lambda i, j, k: (k, j)),   # W tile
                pl.BlockSpec((1, tn_b), lambda i, j, k: (0, j)),    # bias
                pl.BlockSpec((br_b, tn_b), lambda i, j, k: (i, j)), # residual
            ],
            out_specs=pl.BlockSpec((br_b, tn_b), lambda i, j, k: (i, j)),
            scratch_shapes=[pltpu.VMEM((br_b, tn_b), jnp.float32)],
        ),
        compiler_params=pltpu.CompilerParams(
            dimension_semantics=sem,
            vmem_limit_bytes=vmem_limit,
        ),
        cost_estimate=cost,
    )(x, w_t, b2, x)


# ----------------------------------------------------------------------------
# Self-test
# ----------------------------------------------------------------------------
def _reference(x, w_t, b):
    y = jnp.dot(x, w_t, precision=jax.lax.Precision.HIGHEST) + b + x
    return jnp.maximum(y, 0.0)


def _run_case(key, batch, input_size, force_k_tiling=False):
    kx, kw, kb = jax.random.split(key, 3)
    # Mimic nn.Linear default init: U(-1/sqrt(D), 1/sqrt(D)).
    bound = 1.0 / float(input_size) ** 0.5
    # PyTorch stores W as (out_features, in_features); pre-transpose once.
    w = jax.random.uniform(kw, (input_size, input_size), jnp.float32, -bound, bound)
    b = jax.random.uniform(kb, (input_size,), jnp.float32, -bound, bound)
    x = jax.random.normal(kx, (batch, input_size), jnp.float32)
    w_t = w.T

    out = jax.block_until_ready(
        resblock_forward(x, w_t, b, force_k_tiling=force_k_tiling))
    ref = _reference(x, w_t, b)
    assert out.shape == (batch, input_size)
    assert jnp.allclose(out, ref, atol=1e-4, rtol=1e-4), (
        f"mismatch vs reference at batch={batch}, D={input_size}, "
        f"k_tiled={force_k_tiling}")


if __name__ == "__main__":
    key = jax.random.PRNGKey(0)
    k1, k2, k3 = jax.random.split(key, 3)
    # Module's toy shape (small / unaligned-D full-width fallback).
    _run_case(k1, batch=8, input_size=32)
    # Lane-dense shape on the main full-K path (residual sliced from x tile).
    _run_case(k2, batch=256, input_size=128)
    # Exercise the K-tiled fallback path (accumulator + pl.when init/finalize).
    _run_case(k3, batch=64, input_size=256, force_k_tiling=True)
    print("KERNEL_OK")
</pallas_src>

<mosaic_0001>
module attributes {stable_mosaic.version = 11 : i64} {
  func.func @_resblock_full_k_kernel(%arg0: i32, %arg1: i32, %arg2: memref<8x32xf32, #tpu.memory_space<vmem>>, %arg3: memref<32x32xf32, #tpu.memory_space<vmem>>, %arg4: memref<1x32xf32, #tpu.memory_space<vmem>>, %arg5: memref<8x32xf32, #tpu.memory_space<vmem>>) attributes {dimension_semantics = [#tpu.dimension_semantics<parallel>, #tpu.dimension_semantics<arbitrary>], iteration_bounds = array<i64: 1, 1>, scalar_prefetch = 0 : i64, scratch_operands = 0 : i64, tpu.core_type = #tpu.core_type<tc>, window_params = [{transform_indices = @transform_0, window_bounds = array<i64: 8, 32>}, {transform_indices = @transform_1, window_bounds = array<i64: 32, 32>}, {transform_indices = @transform_2, window_bounds = array<i64: 1, 32>}, {transform_indices = @transform_3, window_bounds = array<i64: 8, 32>}]} {
    %c0 = arith.constant 0 : index
    %c0_0 = arith.constant 0 : index
    %0 = vector.load %arg2[%c0, %c0_0] : memref<8x32xf32, #tpu.memory_space<vmem>>, vector<8x32xf32>
    %c0_1 = arith.constant 0 : index
    %c0_2 = arith.constant 0 : index
    %1 = vector.load %arg3[%c0_1, %c0_2] : memref<32x32xf32, #tpu.memory_space<vmem>>, vector<32x32xf32>
    %cst = arith.constant dense<0.000000e+00> : vector<8x32xf32>
    %2 = tpu.matmul %0, %1, %cst {dimension_numbers = #tpu.dot_dimension_numbers<[1], [0], [0], [1], [0, 0, 1, 1], [], []>} : vector<8x32xf32>, vector<32x32xf32>, vector<8x32xf32> -> vector<8x32xf32>
    %c0_3 = arith.constant 0 : index
    %c0_4 = arith.constant 0 : index
    %3 = vector.load %arg2[%c0_3, %c0_4] : memref<8x32xf32, #tpu.memory_space<vmem>>, vector<8x32xf32>
    %c0_5 = arith.constant 0 : index
    %c0_6 = arith.constant 0 : index
    %4 = vector.load %arg4[%c0_5, %c0_6] : memref<1x32xf32, #tpu.memory_space<vmem>>, vector<1x32xf32>
    %5 = vector.broadcast %4 : vector<1x32xf32> to vector<8x32xf32>
    %6 = arith.addf %2, %5 : vector<8x32xf32>
    %7 = arith.addf %6, %3 : vector<8x32xf32>
    %cst_7 = arith.constant 0.000000e+00 : f32
    %8 = vector.broadcast %cst_7 : f32 to vector<8x32xf32>
    %9 = arith.maximumf %7, %8 : vector<8x32xf32>
    %c0_8 = arith.constant 0 : index
    %c0_9 = arith.constant 0 : index
    %10 = vector.load %arg5[%c0_8, %c0_9] : memref<8x32xf32, #tpu.memory_space<vmem>>, vector<8x32xf32>
    tpu.vector_store %arg5[%c0_8, %c0_9], %9 {strides = array<i32>} : memref<8x32xf32, #tpu.memory_space<vmem>>, vector<8x32xf32>,
    return
  }
  func.func @transform_0(%arg0: i32, %arg1: i32) -> (i32, i32) {
    %c0_i32 = arith.constant 0 : i32
    %c0_i32_0 = arith.constant 0 : i32
    return %arg0, %c0_i32 : i32, i32
  }
  func.func @transform_1(%arg0: i32, %arg1: i32) -> (i32, i32) {
    %c0_i32 = arith.constant 0 : i32
    %c0_i32_0 = arith.constant 0 : i32
    return %c0_i32, %arg1 : i32, i32
  }
  func.func @transform_2(%arg0: i32, %arg1: i32) -> (i32, i32) {
    %c0_i32 = arith.constant 0 : i32
    %c0_i32_0 = arith.constant 0 : i32
    return %c0_i32, %arg1 : i32, i32
  }
  func.func @transform_3(%arg0: i32, %arg1: i32) -> (i32, i32) {
    %c0_i32 = arith.constant 0 : i32
    return %arg0, %arg1 : i32, i32
  }
}

</mosaic_0001>

<bundles_post_ra>
// kernel: resblock_forward.1
= control target key start
LH: loop header
LB: loop body
LE: loop exit
PB: predicated region body
PF: predicated region fallthrough
CT: control target
= control target key end

     0   :  { %8 = vsyncpa [#allocation3], 0  ;;  %s324_s0 = inlined_call_operand.hbm [shape: f32[8,32], index: 0, kind: input, shape index: {}]   ;;  %s325_s1 = inlined_call_operand.hbm [shape: f32[32,32], index: 1, kind: input, shape index: {}]   ;;  %s326_s2 = inlined_call_operand.vmem [shape: f32[1,32], index: 2, kind: input, shape index: {}]   ;;  %s327_s3 = inlined_call_operand.hbm [shape: f32[8,32], index: 3, kind: output, shape index: {}]  }
   0x1   :  { %9 = vsyncpa [#allocation6], 0 }
   0x2   :  { %10 = vsyncpa [#allocation4], 0  ;;  %s250_s12 = smov [#allocation2]   ;;  %s251_s14 = smov [#allocation5]  }
   0x3   :  { %s17_s13 = sshll.u32 %s250_s12, 4  ;;  %s26_s15 = sshll.u32 %s251_s14, 4  ;;  %s18_s13 = int_to_ptr.vmem [resolvable:$true] %s17_s13  ;;  %s278_s15 = int_to_ptr.vmem [resolvable:$true] %s26_s15 }
   0x4   :  { %s178_s18 = scalar_lea.hbm %s324_s0, 128 }
   0x5   :  { %p179_p0 = scmp.ne.s32.totalorder %s324_s0, %s178_s18  ;;  %p182_p1 = scmp.lt.u32.totalorder %s178_s18, %s324_s0 }
   0x7   :  { %p184_p2 = pnand %p182_p1, %p179_p0 }
   0x9   :  { %187 = shalt.err (!%p184_p2)
}
   0xa   :  { %s188_s23 = scalar_lea.vmem %s18_s13, 128  ;;  %p193_p4 = scmp.lt.s32.totalorder %s18_s13, %s18_s13 }
   0xb   :  { %p189_p3 = scmp.ne.s32.totalorder %s18_s13, %s188_s23  ;;  %p194_p5 = scmp.lt.s32.totalorder %s188_s23, %s188_s23 }
   0xd   :  { %p195_p6 = por %p194_p5, %p193_p4 }
   0xf   :  { %p196_p7 = pnand %p195_p6, %p189_p3 }
  0x11   :  { %199 = shalt.err (!%p196_p7)
}
  0x12   :  { %20 = dma.hbm_to_vmem [thread:$0]  %s324_s0, 128, %s18_s13, [#allocation3]  }
  0x13   :  { %s200_s28 = scalar_lea.hbm %s325_s1, 512 }
  0x14   :  { %p201_p8 = scmp.ne.s32.totalorder %s325_s1, %s200_s28  ;;  %p204_p9 = scmp.lt.u32.totalorder %s200_s28, %s325_s1 }
  0x16   :  { %p206_p10 = pnand %p204_p9, %p201_p8 }
  0x18   :  { %209 = shalt.err (!%p206_p10)
}
  0x19   :  { %s210_s6 = scalar_lea.vmem %s278_s15, 512  ;;  %p215_p12 = scmp.lt.s32.totalorder %s278_s15, %s278_s15 }
  0x1a   :  { %p211_p11 = scmp.ne.s32.totalorder %s278_s15, %s210_s6  ;;  %p216_p13 = scmp.lt.s32.totalorder %s210_s6, %s210_s6 }
  0x1c   :  { %p217_p0 = por %p216_p13, %p215_p12 }
  0x1e   :  { %p218_p1 = pnand %p217_p0, %p211_p11 }
  0x20   :  { %221 = shalt.err (!%p218_p1)
}
  0x21   :  { %s252_s0 = smov 128   ;;  %s253_s7 = smov 8  }
  0x22   :  { %32 = dma.hbm_to_vmem [thread:$0]  %s325_s1, 512, %s278_s15, [#allocation6], %s252_s0, %s252_s0, %s253_s7  }
  0x23   :  { %244 = dma.done.wait [#allocation3], 128  }
  0x24   :  { %245 = vsyncadd [#allocation3], 4294967168 }
  0x25   :  { %246 = dma.done.wait [#allocation6], 512  }
  0x26   :  { %247 = vsyncadd [#allocation6], 4294966784  ;;  %v254_v0 = vmov 0.0|0.0   ;;  %vm255_vm0 = vmmov 0   ;;  %v256_v1 = vmov 0.0   ;;  %v42_v2 = vld [vmem:[#allocation5] sm:$0xff] }
  0x27   :  { %164 = vmatprep.subr.bf16.mxu0 %v254_v0  ;;  %161 = vmatprep.mubr.msk.f32.mxu0 %vm255_vm0, %v256_v1  ;;  %v43_v3 = vld [vmem:[#allocation5 + $0x8] sm:$0xff]  ;;  %v44_v4 = vld [vmem:[#allocation5 + $0x10] sm:$0xff]  ;;  %v45_v6 = vld [vmem:[#allocation5 + $0x18] sm:$0xff]  ;;  %vm53_vm1 = vcmask 261120   ;;  %s257_s11 = smov [#allocation7]  }
  0x28   :  { %v165_v5 = vpack.c.bf16 %v43_v3, %v42_v2  ;;  %v168_v7 = vpack.c.bf16 %v45_v6, %v44_v4  ;;  %v41_v8 = vld [vmem:[#allocation2] sm:$0xff]  ;;  %s136_s12 = sshll.u32 %s257_s11, 4  ;;  %s137_s12 = int_to_ptr.vmem [resolvable:$true] %s136_s12 }
  0x29   :  { %v146_v9 = vld [vmem:[%s326_s2] ss:$0 sm:$0xff]  ;;  %s222_s13 = scalar_lea.vmem %s137_s12, 128  ;;  %p227_p3 = scmp.lt.s32.totalorder %s137_s12, %s137_s12 }
  0x2a   :  { %166 = vmatpush3.bf16.msra.mxu0 %v165_v5  ;;  %p223_p2 = scmp.ne.s32.totalorder %s137_s12, %s222_s13  ;;  %p228_p4 = scmp.lt.s32.totalorder %s222_s13, %s222_s13 }
  0x2b   :  { %167 = vmatprep.subr.bf16.mxu0 %v254_v0 }
  0x2c   :  { %p229_p5 = por %p228_p4, %p227_p3 }
  0x2e   :  { %169 = vmatpush3.bf16.msra.mxu0 %v168_v7  ;;  %p230_p6 = pnand %p229_p5, %p223_p2 }
  0x31   :  { %162 = vmatmul.mubr.msk.f32.vlgmr.msra.gmra.mrb[0].mxu0 %vm53_vm1, %v41_v8 }
 0x104   :  { %v123_v10 = vpop.f32.mrb[0].mxu0 }
 0x105   :  { %v124_v11 = vadd.f32 %v146_v9, %v123_v10  ;;  %v163_v12 = vpop.f32.mrb[1].mxu0 }
 0x107   :  { %v127_v13 = vadd.f32 %v124_v11, %v41_v8 }
 0x109   :  { %v128_v14 = vmax.f32 %v127_v13, 0.0 }
 0x10b   :  { %129 = vst.msk [vmem:[#allocation7] sm:$0xff] %vm53_vm1, %v128_v14 }
 0x10c   :  { %233 = shalt.err (!%p230_p6)
}
 0x10d   :  { %s234_s2 = scalar_lea.hbm %s327_s3, 128 }
 0x10e   :  { %p235_p7 = scmp.ne.s32.totalorder %s327_s3, %s234_s2  ;;  %p238_p8 = scmp.lt.u32.totalorder %s234_s2, %s327_s3 }
 0x110   :  { %p240_p9 = pnand %p238_p8, %p235_p7 }
 0x112   :  { %243 = shalt.err (!%p240_p9)
}
 0x113   :  { %139 = dma.vmem_to_hbm [thread:$0]  %s137_s12, 128, %s327_s3, [#allocation4]  }
 0x114   :  { %248 = dma.done.wait [#allocation4], 128  }
 0x115   :  { %249 = vsyncadd [#allocation4], 4294967168 }
 0x116   :  { %143 = vsyncpa [#allocation3], 1 }
 0x117   :  { %144 = vsyncpa [#allocation6], 1 }
 0x118   :  { %145 = vsyncpa [#allocation4], 1 }

</bundles_post_ra>
